<compile_context>
chip_gen: v6e
topology: v6e:2x2x1
jax: 0.10.0
libtpu: 0.0.40
codegen_flags: <defaults>
</compile_context>

<pallas_src>
import functools

import jax
import jax.numpy as jnp
from jax.experimental import pallas as pl
from jax.experimental.pallas import tpu as pltpu

_EPS = 1e-7
_VMEM_LIMIT = 32 * 1024 * 1024  # explicit, safe on v5e/v6e/v7x


def _ceil_to(a, b):
    return -(-a // b) * b


# ----------------------------------------------------------------------------
# kernels
# ----------------------------------------------------------------------------
def _bce_elementwise(w_ref, x_ref, t_ref):
    """Shared elementwise hot path: clamp, log, weight, combine (in f32)."""
    x = jnp.clip(x_ref[...].astype(jnp.float32), _EPS, 1.0 - _EPS)
    t = t_ref[...].astype(jnp.float32)
    w0 = w_ref[0]
    w1 = w_ref[1]
    # torch clamps the logs at -100; after the eps-clip the logs are already
    # >= log(1e-7) ~ -16.1, so that clamp is a no-op and is omitted.
    return -w1 * t * jnp.log(x) - (1.0 - t) * w0 * jnp.log(1.0 - x)


def _bce_partial_sum_kernel(w_ref, x_ref, t_ref, out_ref, *,
                            tile_elems, tile_cols, valid_elems, needs_mask):
    """Scalar-mean path: one lane-dense (1, TILE_C) partial sum per grid step."""
    bce = _bce_elementwise(w_ref, x_ref, t_ref)
    if needs_mask:
        # Zero out the flat-padding elements (only the last tile has any).
        base = pl.program_id(0) * tile_elems
        rid = jax.lax.broadcasted_iota(jnp.int32, bce.shape, 0)
        cid = jax.lax.broadcasted_iota(jnp.int32, bce.shape, 1)
        idx = base + rid * tile_cols + cid
        bce = jnp.where(idx < valid_elems, bce, 0.0)
    # Sublane reduce only (mostly VPU adds); the cross-lane reduce happens
    # once, outside the kernel, on the tiny partial-sum array.
    out_ref[...] = jnp.sum(bce, axis=0, keepdims=True)


def _bce_rowmean_kernel(w_ref, x_ref, t_ref, out_ref, *, inv_w):
    """reduction='none' path: mean over the last dim for a tile of rows."""
    bce = _bce_elementwise(w_ref, x_ref, t_ref)
    out_ref[...] = jnp.sum(bce, axis=-1, keepdims=True) * inv_w


# ----------------------------------------------------------------------------
# tile selection
# ----------------------------------------------------------------------------
_SUM_TILES = ((512, 1024), (256, 1024), (128, 1024), (64, 1024), (32, 1024),
              (16, 1024), (8, 1024), (8, 512), (8, 256), (8, 128))


def _pick_sum_tile(n):
    """Lane-dense tile for the flattened scalar-mean path."""
    min_elems = min(n, 64 * 1024)
    # Prefer an exactly-dividing, reasonably large tile (no padding / masking).
    for tr, tc in _SUM_TILES:
        te = tr * tc
        if min_elems <= te <= n and n % te == 0:
            return tr, tc
    # Otherwise take a big tile and pad + mask the tail.
    for tr, tc in _SUM_TILES:
        if tr * tc <= max(n, 8 * 128):
            return tr, tc
    return 8, 128


def _pick_row_tile(rows, w):
    """Row tile for reduction='none'; ~<=2 MiB per input block (f32 bound)."""
    budget_rows = max(8, (2 * 1024 * 1024) // (4 * w))
    cands = [r for r in (8192, 4096, 2048, 1024, 512, 256, 128, 64, 32, 16, 8)
             if r <= budget_rows]
    if not cands:
        cands = [8]
    # Prefer an exactly-dividing, reasonably large tile.
    for r in cands:
        if min(rows, 1024) <= r <= rows and rows % r == 0:
            return r
    # Otherwise largest affordable tile; wrapper pads the ragged rows.
    return next((r for r in cands if r <= rows), 8)


# ----------------------------------------------------------------------------
# module
# ----------------------------------------------------------------------------
class BCELossClassWeighted:
    """JAX/Pallas port of the PyTorch BCELoss_class_weighted module."""

    def __init__(self, weights, reduction=None):
        weights = jnp.asarray(weights, dtype=jnp.float32)
        assert weights.shape[0] == 2
        self.weights = weights
        self.reduction = reduction

    def __call__(self, inputs, target):
        assert inputs.shape == target.shape
        if self.reduction == "none":
            return self._row_mean(inputs, target)
        return self._scalar_mean(inputs, target)

    # --- default reduction: scalar mean over every element -------------------
    def _scalar_mean(self, inputs, target):
        n = int(inputs.size)
        x = inputs.reshape(-1)
        t = target.reshape(-1)

        tr, tc = _pick_sum_tile(n)
        tile_elems = tr * tc
        padded = _ceil_to(n, tile_elems)
        if padded != n:
            # Pad value only needs to be log-safe; padded elems are masked out.
            x = jnp.pad(x, (0, padded - n), constant_values=0.5)
            t = jnp.pad(t, (0, padded - n), constant_values=0.0)
        grid_n = padded // tile_elems
        x2 = x.reshape(grid_n * tr, tc)
        t2 = t.reshape(grid_n * tr, tc)

        kernel = functools.partial(
            _bce_partial_sum_kernel,
            tile_elems=tile_elems, tile_cols=tc,
            valid_elems=n, needs_mask=(padded != n))

        partials = pl.pallas_call(
            kernel,
            out_shape=jax.ShapeDtypeStruct((grid_n, tc), jnp.float32),
            grid=(grid_n,),
            in_specs=[
                pl.BlockSpec(memory_space=pltpu.MemorySpace.SMEM),  # weights
                pl.BlockSpec((tr, tc), lambda i: (i, 0)),
                pl.BlockSpec((tr, tc), lambda i: (i, 0)),
            ],
            out_specs=pl.BlockSpec((1, tc), lambda i: (i, 0)),
            compiler_params=pltpu.CompilerParams(
                dimension_semantics=("parallel",),
                vmem_limit_bytes=_VMEM_LIMIT),
        )(self.weights, x2, t2)
        # Tiny (grid_n, TILE_C) f32 final reduction done by XLA.
        return jnp.sum(partials) / jnp.float32(n)

    # --- reduction='none': mean over the last dim -----------------------------
    def _row_mean(self, inputs, target):
        orig_shape = inputs.shape
        w = orig_shape[-1]
        rows = 1
        for d in orig_shape[:-1]:
            rows *= d

        x2 = inputs.reshape(rows, w)
        t2 = target.reshape(rows, w)

        row_tile = _pick_row_tile(rows, w)
        padded_rows = _ceil_to(rows, row_tile)
        if padded_rows != rows:
            pad = padded_rows - rows
            x2 = jnp.pad(x2, ((0, pad), (0, 0)), constant_values=0.5)
            t2 = jnp.pad(t2, ((0, pad), (0, 0)), constant_values=0.0)
        grid_n = padded_rows // row_tile

        kernel = functools.partial(_bce_rowmean_kernel, inv_w=1.0 / w)
        out = pl.pallas_call(
            kernel,
            out_shape=jax.ShapeDtypeStruct((padded_rows, 1), jnp.float32),
            grid=(grid_n,),
            in_specs=[
                pl.BlockSpec(memory_space=pltpu.MemorySpace.SMEM),  # weights
                pl.BlockSpec((row_tile, w), lambda i: (i, 0)),
                pl.BlockSpec((row_tile, w), lambda i: (i, 0)),
            ],
            out_specs=pl.BlockSpec((row_tile, 1), lambda i: (i, 0)),
            compiler_params=pltpu.CompilerParams(
                dimension_semantics=("parallel",),
                vmem_limit_bytes=_VMEM_LIMIT),
        )(self.weights, x2, t2)
        # Note: output is lane-width 1 (per-row means); its traffic is W x
        # smaller than the inputs, so narrow stores are a minor cost here.
        return out[:rows, 0].reshape(orig_shape[:-1])


# ----------------------------------------------------------------------------
# reference + demo
# ----------------------------------------------------------------------------
def _reference(weights, inputs, target, reduction):
    x = jnp.clip(inputs.astype(jnp.float32), _EPS, 1.0 - _EPS)
    t = target.astype(jnp.float32)
    bce = (-weights[1] * t * jnp.maximum(jnp.log(x), -100.0)
           - (1.0 - t) * weights[0] * jnp.maximum(jnp.log(1.0 - x), -100.0))
    if reduction == "none":
        return jnp.mean(bce, axis=-1)
    return jnp.mean(bce)


if __name__ == "__main__":
    key = jax.random.PRNGKey(0)
    weights = jnp.array([0.3, 0.7], dtype=jnp.float32)  # deterministic init

    def run_case(shape, kx, kt):
        x = jax.random.uniform(kx, shape, dtype=jnp.float32)
        t = (jax.random.uniform(kt, shape, dtype=jnp.float32) > 0.5
             ).astype(jnp.float32)

        # Default reduction (scalar mean).
        loss_fn = BCELossClassWeighted(weights, reduction=None)
        got = jax.block_until_ready(loss_fn(x, t))
        want = _reference(weights, x, t, None)
        assert jnp.allclose(got, want, rtol=1e-5, atol=1e-5), (shape, got, want)

        # reduction='none' (mean over last dim).
        loss_fn_none = BCELossClassWeighted(weights, reduction="none")
        got_none = jax.block_until_ready(loss_fn_none(x, t))
        want_none = _reference(weights, x, t, "none")
        assert got_none.shape == shape[:-1]
        assert jnp.allclose(got_none, want_none, rtol=1e-5, atol=1e-5), shape

    keys = jax.random.split(key, 4)
    run_case((2, 4, 16, 16), keys[0], keys[1])  # tile-aligned NCHW case
    run_case((3, 5, 7, 9), keys[2], keys[3])    # ragged case: pad + mask paths

    print("KERNEL_OK")
</pallas_src>

<mosaic_0001>
module attributes {stable_mosaic.version = 11 : i64} {
  func.func @_bce_partial_sum_kernel(%arg0: i32, %arg1: memref<2xf32, #tpu.memory_space<smem>>, %arg2: memref<8x256xf32, #tpu.memory_space<vmem>>, %arg3: memref<8x256xf32, #tpu.memory_space<vmem>>, %arg4: memref<1x256xf32, #tpu.memory_space<vmem>>) attributes {dimension_semantics = [#tpu.dimension_semantics<parallel>], iteration_bounds = array<i64: 1>, scalar_prefetch = 0 : i64, scratch_operands = 0 : i64, tpu.core_type = #tpu.core_type<tc>, window_params = [{transform_indices = @transform_0, window_bounds = array<i64: 2>}, {transform_indices = @transform_1, window_bounds = array<i64: 8, 256>}, {transform_indices = @transform_2, window_bounds = array<i64: 8, 256>}, {transform_indices = @transform_3, window_bounds = array<i64: 1, 256>}]} {
    %c0 = arith.constant 0 : index
    %c0_0 = arith.constant 0 : index
    %0 = vector.load %arg2[%c0, %c0_0] : memref<8x256xf32, #tpu.memory_space<vmem>>, vector<8x256xf32>
    %cst = arith.constant 1.000000e-07 : f32
    %cst_1 = arith.constant 0.99999988 : f32
    %1 = vector.broadcast %cst : f32 to vector<8x256xf32>
    %2 = arith.maximumf %1, %0 : vector<8x256xf32>
    %3 = vector.broadcast %cst_1 : f32 to vector<8x256xf32>
    %4 = arith.minimumf %3, %2 : vector<8x256xf32>
    %c0_2 = arith.constant 0 : index
    %c0_3 = arith.constant 0 : index
    %5 = vector.load %arg3[%c0_2, %c0_3] : memref<8x256xf32, #tpu.memory_space<vmem>>, vector<8x256xf32>
    %c0_4 = arith.constant 0 : index
    %6 = memref.load %arg1[%c0_4] : memref<2xf32, #tpu.memory_space<smem>>
    %c1 = arith.constant 1 : index
    %7 = memref.load %arg1[%c1] : memref<2xf32, #tpu.memory_space<smem>>
    %cst_5 = arith.constant 0.000000e+00 : f32
    %8 = arith.subf %cst_5, %7 : f32
    %9 = vector.broadcast %8 : f32 to vector<8x256xf32>
    %10 = arith.mulf %9, %5 : vector<8x256xf32>
    %11 = math.log %4 : vector<8x256xf32>
    %12 = arith.mulf %10, %11 : vector<8x256xf32>
    %cst_6 = arith.constant 1.000000e+00 : f32
    %13 = vector.broadcast %cst_6 : f32 to vector<8x256xf32>
    %14 = arith.subf %13, %5 : vector<8x256xf32>
    %15 = vector.broadcast %6 : f32 to vector<8x256xf32>
    %16 = arith.mulf %14, %15 : vector<8x256xf32>
    %cst_7 = arith.constant 1.000000e+00 : f32
    %17 = vector.broadcast %cst_7 : f32 to vector<8x256xf32>
    %18 = arith.subf %17, %4 : vector<8x256xf32>
    %19 = math.log %18 : vector<8x256xf32>
    %20 = arith.mulf %16, %19 : vector<8x256xf32>
    %21 = arith.subf %12, %20 : vector<8x256xf32>
    %cst_8 = arith.constant dense<0.000000e+00> : vector<256xf32>
    %22 = vector.multi_reduction <add>, %21, %cst_8 [0] : vector<8x256xf32> to vector<256xf32>
    %23 = vector.shape_cast %22 : vector<256xf32> to vector<1x256xf32>
    %c0_9 = arith.constant 0 : index
    %c0_10 = arith.constant 0 : index
    %24 = vector.load %arg4[%c0_9, %c0_10] : memref<1x256xf32, #tpu.memory_space<vmem>>, vector<1x256xf32>
    tpu.vector_store %arg4[%c0_9, %c0_10], %23 {strides = array<i32>} : memref<1x256xf32, #tpu.memory_space<vmem>>, vector<1x256xf32>,
    return
  }
  func.func @transform_0(%arg0: i32) -> i32 {
    %c0_i32 = arith.constant 0 : i32
    %c0_i32_0 = arith.constant 0 : i32
    return %c0_i32 : i32
  }
  func.func @transform_1(%arg0: i32) -> (i32, i32) {
    %c0_i32 = arith.constant 0 : i32
    %c0_i32_0 = arith.constant 0 : i32
    return %arg0, %c0_i32 : i32, i32
  }
  func.func @transform_2(%arg0: i32) -> (i32, i32) {
    %c0_i32 = arith.constant 0 : i32
    %c0_i32_0 = arith.constant 0 : i32
    return %arg0, %c0_i32 : i32, i32
  }
  func.func @transform_3(%arg0: i32) -> (i32, i32) {
    %c0_i32 = arith.constant 0 : i32
    %c0_i32_0 = arith.constant 0 : i32
    return %arg0, %c0_i32 : i32, i32
  }
}

</mosaic_0001>

<bundles_post_ra>
// kernel: tpu_custom_call.1
= control target key start
LH: loop header
LB: loop body
LE: loop exit
PB: predicated region body
PF: predicated region fallthrough
CT: control target
= control target key end

     0   :  { %8 = vsyncpa [#allocation5], 0  ;;  %s264_s0 = inlined_call_operand.hbm [shape: f32[2], index: 0, kind: input, shape index: {}]   ;;  %s265_s1 = inlined_call_operand.hbm [shape: f32[8,256], index: 1, kind: input, shape index: {}]   ;;  %s266_s2 = inlined_call_operand.hbm [shape: f32[8,256], index: 2, kind: input, shape index: {}]   ;;  %s267_s3 = inlined_call_operand.hbm [shape: f32[1,256], index: 3, kind: output, shape index: {}]  }
   0x1   :  { %9 = vsyncpa [#allocation3], 0 }
   0x2   :  { %10 = vsyncpa [#allocation8], 0 }
   0x3   :  { %11 = vsyncpa [#allocation4], 0  ;;  %s227_s12 = smov [#allocation2]   ;;  %s228_s15 = smov [#allocation6]  }
   0x4   :  { %19 = dma.hbm_to_smem %s264_s0, 16, %s227_s12, [#allocation5]  }
   0x5   :  { %s26_s16 = sshll.u32 %s228_s15, 4  ;;  %s229_s17 = smov [#allocation7]   ;;  %s27_s16 = int_to_ptr.vmem [resolvable:$true] %s26_s16 }
   0x6   :  { %s36_s18 = sshll.u32 %s229_s17, 4  ;;  %s167_s19 = scalar_lea.vmem %s27_s16, 256  ;;  %s37_s18 = int_to_ptr.vmem [resolvable:$true] %s36_s18 }
   0x7   :  { %p168_p0 = scmp.ne.s32.totalorder %s27_s16, %s167_s19  ;;  %p172_p1 = scmp.lt.s32.totalorder %s27_s16, %s27_s16 }
   0x8   :  { %p173_p2 = scmp.lt.s32.totalorder %s167_s19, %s167_s19 }
   0xa   :  { %p174_p3 = por %p173_p2, %p172_p1 }
   0xc   :  { %p175_p4 = pnand %p174_p3, %p168_p0 }
   0xe   :  { %178 = shalt.err (!%p175_p4)
}
   0xf   :  { %29 = dma.hbm_to_vmem [thread:$0]  %s265_s1, 256, %s27_s16, [#allocation3]  }
  0x10   :  { %s187_s22 = scalar_lea.vmem %s37_s18, 256  ;;  %p192_p6 = scmp.lt.s32.totalorder %s37_s18, %s37_s18 }
  0x11   :  { %p188_p5 = scmp.ne.s32.totalorder %s37_s18, %s187_s22  ;;  %p193_p7 = scmp.lt.s32.totalorder %s187_s22, %s187_s22 }
  0x13   :  { %p194_p8 = por %p193_p7, %p192_p6 }
  0x15   :  { %p195_p9 = pnand %p194_p8, %p188_p5 }
  0x17   :  { %198 = shalt.err (!%p195_p9)
}
  0x18   :  { %39 = dma.hbm_to_vmem [thread:$0]  %s266_s2, 256, %s37_s18, [#allocation8]  }
  0x19   :  { %219 = dma.done.wait [#allocation5], 16  }
  0x1a   :  { %220 = vsyncadd [#allocation5], 4294967280 }
  0x1b   :  { %221 = dma.done.wait [#allocation3], 256  }
  0x1c   :  { %222 = vsyncadd [#allocation3], 4294967040 }
  0x1d   :  { %223 = dma.done.wait [#allocation8], 256  }
  0x1e   :  { %224 = vsyncadd [#allocation8], 4294967040 }
  0x1f   :  { %49 = sfence }
  0x20   :  { %v50_v0 = vld [vmem:[#allocation6] sm:$0xff]  ;;  %v51_v1 = vld [vmem:[#allocation6 + $0x8] sm:$0xff]  ;;  %s137_s1 = sld [smem:[#allocation2 + $0x1]]  ;;  %v56_v8 = vld [vmem:[#allocation7] sm:$0xff]  ;;  %v230_v36 = vmov 1966171168   ;;  %v103_v38 = vlaneseq }
  0x21   :  { %v52_v2 = vmax.f32 %v50_v0, 1e-07  ;;  %v53_v3 = vmax.f32 %v51_v1, 1e-07  ;;  %s58_s2 = sld [smem:[#allocation2]]  ;;  %v57_v9 = vld [vmem:[#allocation7 + $0x8] sm:$0xff]  ;;  %v101_v37 = vunpack.c.l.s4 %v230_v36 }
  0x22   :  { %v70_v11 = vsub.f32 1.0, %v56_v8  ;;  %v71_v12 = vsub.f32 1.0, %v57_v9  ;;  %v104_v44 = vshrl.u32 %v103_v38, 7  ;;  %s231_s25 = smov [#allocation9]   ;;  %vm117_vm0 = vcmp.lt.s32.totalorder %v103_v38, 256 }
  0x23   :  { %v54_v4 = vmin.f32 %v52_v2, 0.9999999  ;;  %v55_v5 = vmin.f32 %v53_v3, 0.9999999  ;;  %v102_v43 = vunpack.c.0.s8 %v101_v37  ;;  %s126_s26 = sshll.u32 %s231_s25, 4  ;;  %s127_s26 = int_to_ptr.vmem [resolvable:$true] %s126_s26 }
  0x24   :  { %s199_s27 = scalar_lea.vmem %s127_s26, 32  ;;  %p204_p11 = scmp.lt.s32.totalorder %s127_s26, %s127_s26 }
  0x25   :  { %143 = vlog2.f32 %v54_v4  ;;  %v75_v6 = vsub.f32 1.0, %v54_v4  ;;  %v76_v7 = vsub.f32 1.0, %v55_v5  ;;  %v105_v49 = vsub.s32 %v102_v43, %v104_v44  ;;  %p200_p10 = scmp.ne.s32.totalorder %s127_s26, %s199_s27  ;;  %p205_p12 = scmp.lt.s32.totalorder %s199_s27, %s199_s27 }
  0x26   :  { %145 = vlog2.f32 %v55_v5  ;;  %s60_s24 = ssub.f32 0.0, %s137_s1 }
  0x27   :  { %147 = vlog2.f32 %v75_v6  ;;  %v72_v13 = vstv %s58_s2  ;;  %p206_p13 = por %p205_p12, %p204_p11 }
  0x28   :  { %149 = vlog2.f32 %v76_v7  ;;  %v61_v10 = vstv %s60_s24  ;;  %v73_v19 = vmul.f32 %v72_v13, %v70_v11  ;;  %v74_v22 = vmul.f32 %v72_v13, %v71_v12 }
  0x29   :  { %v62_v14 = vmul.f32 %v61_v10, %v56_v8  ;;  %v63_v16 = vmul.f32 %v61_v10, %v57_v9  ;;  %p207_p0 = pnand %p206_p13, %p200_p10 }
  0x32   :  { %v144_v15 = vpop.eup %143 }
  0x33   :  { %v146_v17 = vpop.eup %145  ;;  %v65_v18 = vmul.f32 0.6931472, %v144_v15 }
  0x34   :  { %v148_v20 = vpop.eup %147  ;;  %v67_v21 = vmul.f32 0.6931472, %v146_v17 }
  0x35   :  { %v150_v23 = vpop.eup %149  ;;  %v68_v24 = vmul.f32 %v65_v18, %v62_v14  ;;  %v78_v25 = vmul.f32 0.6931472, %v148_v20 }
  0x36   :  { %v69_v26 = vmul.f32 %v67_v21, %v63_v16  ;;  %v80_v27 = vmul.f32 0.6931472, %v150_v23 }
  0x37   :  { %v81_v28 = vmul.f32 %v78_v25, %v73_v19 }
  0x38   :  { %v82_v29 = vmul.f32 %v80_v27, %v74_v22 }
  0x39   :  { %v83_v30 = vsub.f32 %v68_v24, %v81_v28 }
  0x3a   :  { %v84_v31 = vsub.f32 %v69_v26, %v82_v29 }
  0x3b   :  { %v85_v32 = vrot.slane %v83_v30, 4 }
  0x3c   :  { %v91_v33 = vrot.slane %v84_v31, 4 }
  0x3d   :  { %v86_v34 = vadd.f32 %v85_v32, %v83_v30 }
  0x3e   :  { %v92_v35 = vadd.f32 %v91_v33, %v84_v31 }
  0x3f   :  { %v87_v39 = vrot.slane %v86_v34, 2 }
  0x40   :  { %v93_v40 = vrot.slane %v92_v35, 2 }
  0x41   :  { %v88_v41 = vadd.f32 %v87_v39, %v86_v34 }
  0x42   :  { %v94_v42 = vadd.f32 %v93_v40, %v92_v35 }
  0x43   :  { %v89_v45 = vrot.slane %v88_v41, 1 }
  0x44   :  { %v95_v46 = vrot.slane %v94_v42, 1 }
  0x45   :  { %v90_v47 = vadd.f32 %v89_v45, %v88_v41 }
  0x46   :  { %v96_v48 = vadd.f32 %v95_v46, %v94_v42 }
  0x48   :  { %v99_v50 = vcombine.low %v90_v47, %v96_v48 }
  0x4a   :  { %v106_v51 = vrot.slane %v99_v50, %v105_v49 }
  0x4c   :  { %v113_v52 = vrot.slane %v106_v51, %v105_v49 }
  0x4e   :  { %119 = vst.msk [vmem:[#allocation9] sm:$0x3] %vm117_vm0, %v113_v52 }
  0x4f   :  { %210 = shalt.err (!%p207_p0)
}
  0x50   :  { %129 = dma.vmem_to_hbm [thread:$0]  %s127_s26, 32, %s267_s3, [#allocation4]  }
  0x51   :  { %225 = dma.done.wait [#allocation4], 32  }
  0x52   :  { %226 = vsyncadd [#allocation4], 4294967264 }
  0x53   :  { %133 = vsyncpa [#allocation3], 1 }
  0x54   :  { %134 = vsyncpa [#allocation8], 1 }
  0x55   :  { %135 = vsyncpa [#allocation4], 1 }
  0x56   :  { %136 = vsyncpa [#allocation5], 1 }

</bundles_post_ra>
